<compile_context>
chip_gen: v5e
topology: v5e:2x2
jax: 0.10.0
libtpu: 0.0.40
codegen_flags: <defaults>
</compile_context>

<pallas_src>
import jax
import jax.numpy as jnp
from jax.experimental import pallas as pl
from jax.experimental.pallas import tpu as pltpu


def _round_up(n, m):
    return ((n + m - 1) // m) * m


def _encoder_kernel(x_ref, w1_ref, b1_ref, wh_ref, bh_ref, out_ref):
    """One batch tile: hidden layer + fused (mu|logvar) head."""
    x = x_ref[...]                                               # [TB, dim_x]

    # Hidden layer + ReLU (MXU matmul, f32 accumulate, VPU max).
    h = jnp.dot(x, w1_ref[...], preferred_element_type=jnp.float32)
    h = jnp.maximum(h + b1_ref[...], 0.0)                       # [TB, dim_h]

    # Single fused head matmul for both mu and logvar.
    out = jnp.dot(h, wh_ref[...], preferred_element_type=jnp.float32)
    out_ref[...] = (out + bh_ref[...]).astype(out_ref.dtype)    # [TB, 2*dim_z]


def prepare_encoder_params(w1, b1, wmu, bmu, wlv, blv):
    """Fuse the two output heads ONCE per weight set (hoisted out of forward)."""
    w1 = jnp.asarray(w1, jnp.float32)
    b1 = jnp.asarray(b1, jnp.float32).reshape(1, -1)
    wh = jnp.concatenate(
        [jnp.asarray(wmu, jnp.float32), jnp.asarray(wlv, jnp.float32)], axis=1)
    bh = jnp.concatenate(
        [jnp.asarray(bmu, jnp.float32).reshape(1, -1),
         jnp.asarray(blv, jnp.float32).reshape(1, -1)], axis=1)
    return w1, b1, wh, bh


def encoder_forward(x, w1, b1, wh, bh, *, block_b=1024, stream_dtype=None):
    """Forward pass using pre-fused head params.

    stream_dtype: if set (e.g. jnp.bfloat16), x is cast and the output is
    stored in that dtype to halve streamed HBM bytes; weights stay f32 and
    the MXU accumulates in f32.
    """
    B, dim_x = x.shape
    dim_h = w1.shape[1]
    z2 = wh.shape[1]                       # 2 * dim_z
    dim_z = z2 // 2

    if stream_dtype is not None:
        x = x.astype(stream_dtype)
    out_dtype = x.dtype

    # ---- Batch tiling ------------------------------------------------------
    # tb is a multiple of 8 sublanes even for user-supplied block_b; aim for
    # >= 2 grid steps so the "parallel" axis can shard across both v7x
    # TensorCores, while keeping M >= 256 per MXU call when B allows.
    block_b = max(8, (block_b // 8) * 8)
    tb = min(block_b, _round_up(pl.cdiv(B, 2), 8))
    tb = max(tb, min(256, _round_up(B, 8)))
    tb = min(tb, block_b)

    bp = _round_up(B, tb)
    if bp != B:
        x = jnp.pad(x, ((0, bp - B), (0, 0)))
    grid = (bp // tb,)

    # ---- VMEM budget computed from actual tile sizes (v7x has only 64 MiB) --
    x_bytes = jnp.dtype(x.dtype).itemsize
    o_bytes = jnp.dtype(out_dtype).itemsize
    w_bytes = 4 * (dim_x * dim_h + dim_h + dim_h * z2 + z2)
    tile_bytes = 2 * (tb * dim_x * x_bytes + tb * z2 * o_bytes)  # double-buffered
    vmem_limit = min(max(tile_bytes + 2 * w_bytes + (4 << 20), 16 << 20), 64 << 20)

    # Advisory cost for XLA scheduling around the custom call.
    cost = pl.CostEstimate(
        flops=2 * bp * (dim_x * dim_h + dim_h * z2),
        transcendentals=0,
        bytes_accessed=bp * dim_x * x_bytes + bp * z2 * o_bytes + w_bytes,
    )

    out = pl.pallas_call(
        _encoder_kernel,
        out_shape=jax.ShapeDtypeStruct((bp, z2), out_dtype),
        grid=grid,
        in_specs=[
            # x tile marches along the batch axis (pipelined / double-buffered).
            pl.BlockSpec((tb, dim_x), lambda i: (i, 0)),
            # Weights / biases: constant index_map -> resident in VMEM.
            # TODO(synk): pipeline_mode=pl.Buffered(1) on these if dim_h grows
            # to tens of MiB of weights (v7x VMEM headroom).
            pl.BlockSpec((dim_x, dim_h), lambda i: (0, 0)),
            pl.BlockSpec((1, dim_h), lambda i: (0, 0)),
            pl.BlockSpec((dim_h, z2), lambda i: (0, 0)),
            pl.BlockSpec((1, z2), lambda i: (0, 0)),
        ],
        out_specs=pl.BlockSpec((tb, z2), lambda i: (i, 0)),
        compiler_params=pltpu.CompilerParams(
            dimension_semantics=("parallel",),
            vmem_limit_bytes=int(vmem_limit),
        ),
        cost_estimate=cost,
    )(x, w1, b1, wh, bh)

    out = out[:B]
    return out[:, :dim_z], out[:, dim_z:z2]


def init_params(key, dim_x, dim_h, dim_z):
    """Deterministic synthetic parameters (PyTorch-like uniform fan-in init)."""
    ks = jax.random.split(key, 6)

    def lin(kw, kb, fan_in, fan_out):
        bound = 1.0 / jnp.sqrt(fan_in)
        w = jax.random.uniform(kw, (fan_in, fan_out), jnp.float32, -bound, bound)
        b = jax.random.uniform(kb, (1, fan_out), jnp.float32, -bound, bound)
        return w, b

    w1, b1 = lin(ks[0], ks[1], dim_x, dim_h)
    wmu, bmu = lin(ks[2], ks[3], dim_h, dim_z)
    wlv, blv = lin(ks[4], ks[5], dim_h, dim_z)
    return w1, b1, wmu, bmu, wlv, blv


if __name__ == "__main__":
    # Small shapes consistent with the module's forward: x is [batch, dim_x].
    B, dim_x, dim_h, dim_z = 8, 64, 128, 32

    key = jax.random.PRNGKey(0)
    kx, kp = jax.random.split(key)
    x = jax.random.normal(kx, (B, dim_x), jnp.float32)
    raw = init_params(kp, dim_x, dim_h, dim_z)

    # Fuse heads once (hoisted out of the per-call path).
    w1, b1, wh, bh = prepare_encoder_params(*raw)

    # f32 path (strict reference check).
    z_mu, z_logvar = encoder_forward(x, w1, b1, wh, bh)
    jax.block_until_ready((z_mu, z_logvar))

    # Pure-JAX reference.
    rw1, rb1, rwmu, rbmu, rwlv, rblv = raw
    h_ref = jnp.maximum(x @ rw1 + rb1, 0.0)
    mu_ref = h_ref @ rwmu + rbmu
    lv_ref = h_ref @ rwlv + rblv
    assert z_mu.shape == (B, dim_z) and z_logvar.shape == (B, dim_z)
    assert jnp.allclose(z_mu, mu_ref, atol=1e-5, rtol=1e-5)
    assert jnp.allclose(z_logvar, lv_ref, atol=1e-5, rtol=1e-5)

    # bf16 streaming path (halved HBM traffic; loose tolerance).
    z_mu_bf, z_lv_bf = encoder_forward(x, w1, b1, wh, bh,
                                       stream_dtype=jnp.bfloat16)
    jax.block_until_ready((z_mu_bf, z_lv_bf))
    assert jnp.allclose(z_mu_bf.astype(jnp.float32), mu_ref, atol=5e-2, rtol=5e-2)
    assert jnp.allclose(z_lv_bf.astype(jnp.float32), lv_ref, atol=5e-2, rtol=5e-2)

    print("KERNEL_OK")
</pallas_src>

<mosaic_0001>
module attributes {stable_mosaic.version = 11 : i64} {
  func.func @_encoder_kernel(%arg0: i32, %arg1: memref<8x64xf32, #tpu.memory_space<vmem>>, %arg2: memref<64x128xf32, #tpu.memory_space<vmem>>, %arg3: memref<1x128xf32, #tpu.memory_space<vmem>>, %arg4: memref<128x64xf32, #tpu.memory_space<vmem>>, %arg5: memref<1x64xf32, #tpu.memory_space<vmem>>, %arg6: memref<8x64xf32, #tpu.memory_space<vmem>>) attributes {dimension_semantics = [#tpu.dimension_semantics<parallel>], iteration_bounds = array<i64: 1>, scalar_prefetch = 0 : i64, scratch_operands = 0 : i64, tpu.core_type = #tpu.core_type<tc>, window_params = [{transform_indices = @transform_0, window_bounds = array<i64: 8, 64>}, {pipeline_mode = #tpu.pipeline_mode<synchronous>, transform_indices = @transform_1, window_bounds = array<i64: 64, 128>}, {pipeline_mode = #tpu.pipeline_mode<synchronous>, transform_indices = @transform_2, window_bounds = array<i64: 1, 128>}, {pipeline_mode = #tpu.pipeline_mode<synchronous>, transform_indices = @transform_3, window_bounds = array<i64: 128, 64>}, {pipeline_mode = #tpu.pipeline_mode<synchronous>, transform_indices = @transform_4, window_bounds = array<i64: 1, 64>}, {transform_indices = @transform_5, window_bounds = array<i64: 8, 64>}]} {
    %c0 = arith.constant 0 : index
    %c0_0 = arith.constant 0 : index
    %0 = vector.load %arg1[%c0, %c0_0] : memref<8x64xf32, #tpu.memory_space<vmem>>, vector<8x64xf32>
    %c0_1 = arith.constant 0 : index
    %c0_2 = arith.constant 0 : index
    %1 = vector.load %arg2[%c0_1, %c0_2] : memref<64x128xf32, #tpu.memory_space<vmem>>, vector<64x128xf32>
    %cst = arith.constant dense<0.000000e+00> : vector<8x128xf32>
    %2 = tpu.matmul %0, %1, %cst {dimension_numbers = #tpu.dot_dimension_numbers<[1], [0], [0], [1], [0, 0, 1, 1], [], []>} : vector<8x64xf32>, vector<64x128xf32>, vector<8x128xf32> -> vector<8x128xf32>
    %c0_3 = arith.constant 0 : index
    %c0_4 = arith.constant 0 : index
    %3 = vector.load %arg3[%c0_3, %c0_4] : memref<1x128xf32, #tpu.memory_space<vmem>>, vector<1x128xf32>
    %4 = vector.broadcast %3 : vector<1x128xf32> to vector<8x128xf32>
    %5 = arith.addf %2, %4 : vector<8x128xf32>
    %cst_5 = arith.constant 0.000000e+00 : f32
    %6 = vector.broadcast %cst_5 : f32 to vector<8x128xf32>
    %7 = arith.maximumf %5, %6 : vector<8x128xf32>
    %c0_6 = arith.constant 0 : index
    %c0_7 = arith.constant 0 : index
    %8 = vector.load %arg4[%c0_6, %c0_7] : memref<128x64xf32, #tpu.memory_space<vmem>>, vector<128x64xf32>
    %cst_8 = arith.constant dense<0.000000e+00> : vector<8x64xf32>
    %9 = tpu.matmul %7, %8, %cst_8 {dimension_numbers = #tpu.dot_dimension_numbers<[1], [0], [0], [1], [0, 0, 1, 1], [], []>} : vector<8x128xf32>, vector<128x64xf32>, vector<8x64xf32> -> vector<8x64xf32>
    %c0_9 = arith.constant 0 : index
    %c0_10 = arith.constant 0 : index
    %10 = vector.load %arg5[%c0_9, %c0_10] : memref<1x64xf32, #tpu.memory_space<vmem>>, vector<1x64xf32>
    %11 = vector.broadcast %10 : vector<1x64xf32> to vector<8x64xf32>
    %12 = arith.addf %9, %11 : vector<8x64xf32>
    %c0_11 = arith.constant 0 : index
    %c0_12 = arith.constant 0 : index
    %13 = vector.load %arg6[%c0_11, %c0_12] : memref<8x64xf32, #tpu.memory_space<vmem>>, vector<8x64xf32>
    tpu.vector_store %arg6[%c0_11, %c0_12], %12 {strides = array<i32>} : memref<8x64xf32, #tpu.memory_space<vmem>>, vector<8x64xf32>,
    return
  }
  func.func @transform_0(%arg0: i32) -> (i32, i32) {
    %c0_i32 = arith.constant 0 : i32
    %c0_i32_0 = arith.constant 0 : i32
    return %arg0, %c0_i32 : i32, i32
  }
  func.func @transform_1(%arg0: i32) -> (i32, i32) {
    %c0_i32 = arith.constant 0 : i32
    %c0_i32_0 = arith.constant 0 : i32
    %c0_i32_1 = arith.constant 0 : i32
    return %c0_i32, %c0_i32_0 : i32, i32
  }
  func.func @transform_2(%arg0: i32) -> (i32, i32) {
    %c0_i32 = arith.constant 0 : i32
    %c0_i32_0 = arith.constant 0 : i32
    %c0_i32_1 = arith.constant 0 : i32
    return %c0_i32, %c0_i32_0 : i32, i32
  }
  func.func @transform_3(%arg0: i32) -> (i32, i32) {
    %c0_i32 = arith.constant 0 : i32
    %c0_i32_0 = arith.constant 0 : i32
    %c0_i32_1 = arith.constant 0 : i32
    return %c0_i32, %c0_i32_0 : i32, i32
  }
  func.func @transform_4(%arg0: i32) -> (i32, i32) {
    %c0_i32 = arith.constant 0 : i32
    %c0_i32_0 = arith.constant 0 : i32
    %c0_i32_1 = arith.constant 0 : i32
    return %c0_i32, %c0_i32_0 : i32, i32
  }
  func.func @transform_5(%arg0: i32) -> (i32, i32) {
    %c0_i32 = arith.constant 0 : i32
    %c0_i32_0 = arith.constant 0 : i32
    return %arg0, %c0_i32 : i32, i32
  }
}

</mosaic_0001>

<bundles_post_ra>
// kernel: tpu_custom_call.1
= control target key start
LH: loop header
LB: loop body
LE: loop exit
PB: predicated region body
PF: predicated region fallthrough
CT: control target
= control target key end

     0   :  { %s263_s0 = inlined_call_operand.vmem [shape: f32[8,64], index: 0, kind: input, shape index: {}]   ;;  %s264_s1 = inlined_call_operand.vmem [shape: f32[64,128], index: 1, kind: input, shape index: {}]   ;;  %s265_s2 = inlined_call_operand.vmem [shape: f32[1,128], index: 2, kind: input, shape index: {}]   ;;  %s266_s3 = inlined_call_operand.vmem [shape: f32[128,64], index: 3, kind: input, shape index: {}]   ;;  %s267_s4 = inlined_call_operand.vmem [shape: f32[1,64], index: 4, kind: input, shape index: {}]   ;;  %s268_s5 = inlined_call_operand.hbm [shape: f32[8,64], index: 5, kind: output, shape index: {}]  }
   0x1   :  { %v29_v0 = vld [vmem:[%s264_s1 + $0x38] sm:$0xff]  ;;  %v28_v1 = vld [vmem:[%s264_s1 + $0x30] sm:$0xff]  ;;  %v27_v2 = vld [vmem:[%s264_s1 + $0x28] sm:$0xff] }
   0x2   :  { %46 = vmatpush.msra.mxu0 %v29_v0  ;;  %v74_v3 = vld [vmem:[%s266_s3 + $0x78] sm:$0xff]  ;;  %v73_v4 = vld [vmem:[%s266_s3 + $0x70] sm:$0xff]  ;;  %v26_v5 = vld [vmem:[%s264_s1 + $0x20] sm:$0xff] }
   0x3   :  { %79 = vmatpush.msra.mxu1 %v74_v3  ;;  %v72_v6 = vld [vmem:[%s266_s3 + $0x68] sm:$0xff]  ;;  %v25_v7 = vld [vmem:[%s264_s1 + $0x18] sm:$0xff]  ;;  %v71_v8 = vld [vmem:[%s266_s3 + $0x60] sm:$0xff] }
   0x4   :  { %47 = vmatpush.msra.mxu0 %v28_v1  ;;  %v24_v9 = vld [vmem:[%s264_s1 + $0x10] sm:$0xff] }
   0x5   :  { %80 = vmatpush.msra.mxu1 %v73_v4 }
   0x6   :  { %48 = vmatpush.msra.mxu0 %v27_v2 }
   0x7   :  { %81 = vmatpush.msra.mxu1 %v72_v6 }
   0x8   :  { %49 = vmatpush.msra.mxu0 %v26_v5 }
   0x9   :  { %10 = vsyncpa [#allocation3], 0  ;;  %v70_v10 = vld [vmem:[%s266_s3 + $0x58] sm:$0xff]  ;;  %v23_v11 = vld [vmem:[%s264_s1 + $0x8] sm:$0xff]  ;;  %82 = vmatpush.msra.mxu1 %v71_v8  ;;  %vm34_vm0 = vcmask 523264   ;;  %s146_s20 = smov [#allocation2]  }
   0xa   :  { %50 = vmatpush.msra.mxu0 %v25_v7  ;;  %v69_v12 = vld [vmem:[%s266_s3 + $0x50] sm:$0xff]  ;;  %v22_v13 = vld [vmem:[%s264_s1] sm:$0xff]  ;;  %v68_v15 = vld [vmem:[%s266_s3 + $0x48] sm:$0xff]  ;;  %s105_s21 = sshll.u32 %s146_s20, 4  ;;  %s107_s24 = sshll.u32 %s268_s5, 4  ;;  %s106_s21 = int_to_ptr.vmem [resolvable:$true] %s105_s21  ;;  %s108_s24 = int_to_ptr.hbm [resolvable:$true] %s107_s24 }
   0xb   :  { %83 = vmatpush.msra.mxu1 %v70_v10  ;;  %v21_v14 = vld [vmem:[%s263_s0] sm:$0xff]  ;;  %v66_v17 = vld [vmem:[%s266_s3 + $0x38] sm:$0xff]  ;;  %v65_v18 = vld [vmem:[%s266_s3 + $0x30] sm:$0xff] }
   0xc   :  { %51 = vmatpush.msra.mxu0 %v24_v9  ;;  %v67_v16 = vld [vmem:[%s266_s3 + $0x40] sm:$0xff]  ;;  %v64_v19 = vld [vmem:[%s266_s3 + $0x28] sm:$0xff]  ;;  %v62_v21 = vld [vmem:[%s266_s3 + $0x18] sm:$0xff] }
   0xd   :  { %84 = vmatpush.msra.mxu1 %v69_v12  ;;  %v63_v20 = vld [vmem:[%s266_s3 + $0x20] sm:$0xff]  ;;  %v61_v22 = vld [vmem:[%s266_s3 + $0x10] sm:$0xff]  ;;  %v60_v23 = vld [vmem:[%s266_s3 + $0x8] sm:$0xff] }
   0xe   :  { %52 = vmatpush.msra.mxu0 %v23_v11  ;;  %v59_v24 = vld [vmem:[%s266_s3] sm:$0xff] }
   0xf   :  { %85 = vmatpush.msra.mxu1 %v68_v15  ;;  %v118_v25 = vld [vmem:[%s265_s2] ss:$0 sm:$0xff] }
  0x10   :  { %53 = vmatpush.msra.mxu0 %v22_v13  ;;  %v119_v29 = vld [vmem:[%s267_s4] ss:$0 sm:$0xff] }
  0x11   :  { %116 = vmatmul.msk.f32.vlgmr.msra.gmra.mxu0 %vm34_vm0, %v21_v14  ;;  %86 = vmatpush.msra.mxu1 %v67_v16 }
  0x13   :  { %87 = vmatpush.msra.mxu1 %v66_v17 }
  0x15   :  { %88 = vmatpush.msra.mxu1 %v65_v18 }
  0x17   :  { %89 = vmatpush.msra.mxu1 %v64_v19 }
  0x19   :  { %90 = vmatpush.msra.mxu1 %v63_v20 }
  0x1b   :  { %91 = vmatpush.msra.mxu1 %v62_v21 }
  0x1d   :  { %92 = vmatpush.msra.mxu1 %v61_v22 }
  0x1f   :  { %93 = vmatpush.msra.mxu1 %v60_v23 }
  0x21   :  { %94 = vmatpush.msra.mxu1 %v59_v24 }
  0x8e   :  { %v55_v26 = vpop.f32.mrf.mxu0 }
  0x8f   :  { %v56_v27 = vadd.f32 %v118_v25, %v55_v26 }
  0x91   :  { %v58_v28 = vmax.f32 %v56_v27, 0.0 }
  0x93   :  { %95 = vmatmul.f32.vlgmr.msra.gmra.mxu1 %v58_v28 }
 0x110   :  { %v96_v30 = vpop.f32.mrf.mxu1 }
 0x111   :  { %v97_v31 = vadd.f32 %v119_v29, %v96_v30 }
 0x113   :  { %99 = vst.msk [vmem:[#allocation2] sm:$0xff] %vm34_vm0, %v97_v31 }
 0x114   :  { %110 = dma.vmem_to_hbm [thread:$0]  %s106_s21, 128, %s108_s24, [#allocation3]  }
 0x115   :  { %144 = dma.done.wait [#allocation3], 128  }
 0x116   :  { %145 = vsyncadd [#allocation3], 4294967168 }
 0x117   :  { %115 = vsyncpa [#allocation3], 1 }

</bundles_post_ra>
